<compile_context>
chip_gen: v6e
topology: v6e:2x2x1
jax: 0.10.0
libtpu: 0.0.40
codegen_flags: <defaults>
</compile_context>

<pallas_src>
import functools

import jax
import jax.numpy as jnp
from jax import lax
from jax.experimental import pallas as pl
from jax.experimental.pallas import tpu as pltpu


def _make_branch_kernel(precision):
    def kernel(u_ref, w1_ref, b1_ref, w2_ref, b2_ref, o_ref):
        # u_ref:  (TB, h*n)        w1_ref: (h*n, h*hidden)   b1_ref: (1, h*hidden)
        # w2_ref: (h*hidden, h*no) b2_ref: (1, h*no)         o_ref:  (TB, h*no)
        x = u_ref[...].astype(w1_ref.dtype)            # VPU cast, keeps HBM stream narrow
        h1 = jnp.dot(x, w1_ref[...],
                     preferred_element_type=jnp.float32,
                     precision=precision) + b1_ref[...]
        h1 = jnp.maximum(h1, 0.0)                      # ReLU (f32)
        y = jnp.dot(h1.astype(w2_ref.dtype), w2_ref[...],
                    preferred_element_type=jnp.float32,
                    precision=precision) + b2_ref[...]
        o_ref[...] = y.astype(o_ref.dtype)
    return kernel


def pack_branch_weights(w1, b1, w2, b2, *, compute_dtype=jnp.bfloat16):
    """Pack per-step weights into block-diagonal matrices (do this ONCE per
    weight update, not per forward call).

    w1: (h, n, hidden), b1: (h, hidden), w2: (h, hidden, no), b2: (h, no)
    -> (w1bd:(h*n, h*hidden), b1f:(1, h*hidden), w2bd:(h*hidden, h*no), b2f:(1, h*no))
    Weights are cast to compute_dtype; biases stay f32 (added post-accumulation).
    """
    h, n, hidden = w1.shape
    num_outputs = w2.shape[-1]
    hn, hh, ho = h * n, h * hidden, h * num_outputs
    eye_h = jnp.eye(h, dtype=w1.dtype)
    # Off-diagonal blocks are exact zeros -> numerics per branch are unchanged.
    w1bd = (eye_h[:, None, :, None] * w1[:, :, None, :]).reshape(hn, hh)
    w2bd = (eye_h[:, None, :, None] * w2[:, :, None, :]).reshape(hh, ho)
    return (w1bd.astype(compute_dtype),
            b1.reshape(1, hh).astype(jnp.float32),
            w2bd.astype(compute_dtype),
            b2.reshape(1, ho).astype(jnp.float32))


def branch_net_packed(u, w1bd, b1f, w2bd, b2f, *, block_b=8192, out_dtype=None):
    """u: (B, h, n) with pre-packed block-diagonal weights -> (B, h, num_outputs)."""
    B, h, n = u.shape
    hn = h * n
    hh = b1f.shape[-1]
    ho = b2f.shape[-1]
    num_outputs = ho // h
    assert w1bd.shape == (hn, hh) and w2bd.shape == (hh, ho)
    out_dtype = u.dtype if out_dtype is None else out_dtype

    u_flat = u.reshape(B, hn)                          # contiguous reshape, free

    # Large, sublane-aligned batch tiles; pad B so the last step isn't ragged.
    # (For v7x, callers with huge B may want block_b small enough that the grid
    #  has >= ~8 steps so the two TensorCores load-balance.)
    if B <= block_b:
        tb, Bp = B, B
    else:
        tb = max(8, (block_b // 8) * 8)
        Bp = pl.cdiv(B, tb) * tb
        if Bp != B:
            u_flat = jnp.pad(u_flat, ((0, Bp - B), (0, 0)))
    grid = (Bp // tb,)

    # Explicit matmul precision: native single-pass bf16 when weights are bf16,
    # full-f32 passes when the caller packed f32 weights (bit-faithful mode).
    precision = (lax.Precision.HIGHEST if w1bd.dtype == jnp.float32
                 else lax.Precision.DEFAULT)

    out_flat = pl.pallas_call(
        _make_branch_kernel(precision),
        out_shape=jax.ShapeDtypeStruct((Bp, ho), out_dtype),
        grid_spec=pl.GridSpec(
            grid=grid,
            in_specs=[
                # activations: tiled over B only
                pl.BlockSpec((tb, hn), lambda i: (i, 0)),
                # weights / biases: full arrays, VMEM-resident across the grid
                pl.BlockSpec((hn, hh), lambda i: (0, 0)),
                pl.BlockSpec((1, hh), lambda i: (0, 0)),
                pl.BlockSpec((hh, ho), lambda i: (0, 0)),
                pl.BlockSpec((1, ho), lambda i: (0, 0)),
            ],
            out_specs=pl.BlockSpec((tb, ho), lambda i: (i, 0)),
        ),
        compiler_params=pltpu.CompilerParams(
            dimension_semantics=("parallel",)),
    )(u_flat, w1bd, b1f, w2bd, b2f)

    if Bp != B:
        out_flat = out_flat[:B]
    return out_flat.reshape(B, h, num_outputs)


def branch_net(u, w1, b1, w2, b2, *, block_b=8192, compute_dtype=jnp.bfloat16):
    """Convenience wrapper (packs weights per call). Prefer pack_branch_weights
    once + branch_net_packed in hot loops."""
    packed = pack_branch_weights(w1, b1, w2, b2, compute_dtype=compute_dtype)
    return branch_net_packed(u, *packed, block_b=block_b)


def _reference(u, w1, b1, w2, b2):
    # pure-JAX reference matching torch semantics
    outs = []
    for i in range(u.shape[1]):
        x = u[:, i, :]                                       # (B, n)
        h1 = jnp.maximum(x @ w1[i] + b1[i], 0.0)
        outs.append((h1 @ w2[i] + b2[i])[:, None, :])
    return jnp.concatenate(outs, axis=1)


if __name__ == "__main__":
    # small shapes consistent with the module
    B, h, n, hidden, num_outputs = 2, 8, 8, 16, 4

    key = jax.random.PRNGKey(0)
    k_u, k_w1, k_b1, k_w2, k_b2 = jax.random.split(key, 5)

    u = jax.random.normal(k_u, (B, h, n), dtype=jnp.float32)
    # deterministic synthetic params (uniform, roughly matching torch's scale)
    w1 = jax.random.uniform(k_w1, (h, n, hidden), jnp.float32,
                            minval=-1.0 / n ** 0.5, maxval=1.0 / n ** 0.5)
    b1 = jax.random.uniform(k_b1, (h, hidden), jnp.float32,
                            minval=-1.0 / n ** 0.5, maxval=1.0 / n ** 0.5)
    w2 = jax.random.uniform(k_w2, (h, hidden, num_outputs), jnp.float32,
                            minval=-1.0 / hidden ** 0.5, maxval=1.0 / hidden ** 0.5)
    b2 = jax.random.uniform(k_b2, (h, num_outputs), jnp.float32,
                            minval=-1.0 / hidden ** 0.5, maxval=1.0 / hidden ** 0.5)

    ref = _reference(u, w1, b1, w2, b2)

    fwd = jax.jit(functools.partial(branch_net_packed, block_b=8192))

    # 1) bit-faithful f32 path (HIGHEST precision) -- exact semantics check.
    packed_f32 = pack_branch_weights(w1, b1, w2, b2, compute_dtype=jnp.float32)
    out_f32 = jax.block_until_ready(fwd(u, *packed_f32))
    assert out_f32.shape == (B, h, num_outputs)
    assert jnp.allclose(out_f32, ref, atol=1e-5, rtol=1e-5)

    # 2) fast bf16-weight path (default) -- the production configuration.
    packed_bf16 = pack_branch_weights(w1, b1, w2, b2)          # packed once, hoisted
    out_bf16 = jax.block_until_ready(fwd(u, *packed_bf16))
    assert out_bf16.shape == (B, h, num_outputs)
    assert jnp.allclose(out_bf16, ref, atol=3e-2, rtol=3e-2)

    print("KERNEL_OK")
</pallas_src>

<mosaic_0001>
module attributes {stable_mosaic.version = 11 : i64} {
  func.func @kernel(%arg0: i32, %arg1: memref<2x64xf32, #tpu.memory_space<vmem>>, %arg2: memref<64x128xf32, #tpu.memory_space<vmem>>, %arg3: memref<1x128xf32, #tpu.memory_space<vmem>>, %arg4: memref<128x32xf32, #tpu.memory_space<vmem>>, %arg5: memref<1x32xf32, #tpu.memory_space<vmem>>, %arg6: memref<2x32xf32, #tpu.memory_space<vmem>>) attributes {dimension_semantics = [#tpu.dimension_semantics<parallel>], iteration_bounds = array<i64: 1>, scalar_prefetch = 0 : i64, scratch_operands = 0 : i64, tpu.core_type = #tpu.core_type<tc>, window_params = [{transform_indices = @transform_0, window_bounds = array<i64: 2, 64>}, {pipeline_mode = #tpu.pipeline_mode<synchronous>, transform_indices = @transform_1, window_bounds = array<i64: 64, 128>}, {pipeline_mode = #tpu.pipeline_mode<synchronous>, transform_indices = @transform_2, window_bounds = array<i64: 1, 128>}, {pipeline_mode = #tpu.pipeline_mode<synchronous>, transform_indices = @transform_3, window_bounds = array<i64: 128, 32>}, {pipeline_mode = #tpu.pipeline_mode<synchronous>, transform_indices = @transform_4, window_bounds = array<i64: 1, 32>}, {transform_indices = @transform_5, window_bounds = array<i64: 2, 32>}]} {
    %c0 = arith.constant 0 : index
    %c0_0 = arith.constant 0 : index
    %0 = vector.load %arg1[%c0, %c0_0] : memref<2x64xf32, #tpu.memory_space<vmem>>, vector<2x64xf32>
    %c0_1 = arith.constant 0 : index
    %c0_2 = arith.constant 0 : index
    %1 = vector.load %arg2[%c0_1, %c0_2] : memref<64x128xf32, #tpu.memory_space<vmem>>, vector<64x128xf32>
    %cst = arith.constant dense<0.000000e+00> : vector<2x128xf32>
    %2 = tpu.matmul %0, %1, %cst {dimension_numbers = #tpu.dot_dimension_numbers<[1], [0], [0], [1], [0, 0, 1, 1], [], []>, precision = #tpu.contract_precision<fp32>} : vector<2x64xf32>, vector<64x128xf32>, vector<2x128xf32> -> vector<2x128xf32>
    %c0_3 = arith.constant 0 : index
    %c0_4 = arith.constant 0 : index
    %3 = vector.load %arg3[%c0_3, %c0_4] : memref<1x128xf32, #tpu.memory_space<vmem>>, vector<1x128xf32>
    %4 = vector.broadcast %3 : vector<1x128xf32> to vector<2x128xf32>
    %5 = arith.addf %2, %4 : vector<2x128xf32>
    %cst_5 = arith.constant 0.000000e+00 : f32
    %6 = vector.broadcast %cst_5 : f32 to vector<2x128xf32>
    %7 = arith.maximumf %5, %6 : vector<2x128xf32>
    %c0_6 = arith.constant 0 : index
    %c0_7 = arith.constant 0 : index
    %8 = vector.load %arg4[%c0_6, %c0_7] : memref<128x32xf32, #tpu.memory_space<vmem>>, vector<128x32xf32>
    %cst_8 = arith.constant dense<0.000000e+00> : vector<2x32xf32>
    %9 = tpu.matmul %7, %8, %cst_8 {dimension_numbers = #tpu.dot_dimension_numbers<[1], [0], [0], [1], [0, 0, 1, 1], [], []>, precision = #tpu.contract_precision<fp32>} : vector<2x128xf32>, vector<128x32xf32>, vector<2x32xf32> -> vector<2x32xf32>
    %c0_9 = arith.constant 0 : index
    %c0_10 = arith.constant 0 : index
    %10 = vector.load %arg5[%c0_9, %c0_10] : memref<1x32xf32, #tpu.memory_space<vmem>>, vector<1x32xf32>
    %11 = vector.broadcast %10 : vector<1x32xf32> to vector<2x32xf32>
    %12 = arith.addf %9, %11 : vector<2x32xf32>
    %c0_11 = arith.constant 0 : index
    %c0_12 = arith.constant 0 : index
    %13 = vector.load %arg6[%c0_11, %c0_12] : memref<2x32xf32, #tpu.memory_space<vmem>>, vector<2x32xf32>
    tpu.vector_store %arg6[%c0_11, %c0_12], %12 {strides = array<i32>} : memref<2x32xf32, #tpu.memory_space<vmem>>, vector<2x32xf32>,
    return
  }
  func.func @transform_0(%arg0: i32) -> (i32, i32) {
    %c0_i32 = arith.constant 0 : i32
    %c0_i32_0 = arith.constant 0 : i32
    return %arg0, %c0_i32 : i32, i32
  }
  func.func @transform_1(%arg0: i32) -> (i32, i32) {
    %c0_i32 = arith.constant 0 : i32
    %c0_i32_0 = arith.constant 0 : i32
    %c0_i32_1 = arith.constant 0 : i32
    return %c0_i32, %c0_i32_0 : i32, i32
  }
  func.func @transform_2(%arg0: i32) -> (i32, i32) {
    %c0_i32 = arith.constant 0 : i32
    %c0_i32_0 = arith.constant 0 : i32
    %c0_i32_1 = arith.constant 0 : i32
    return %c0_i32, %c0_i32_0 : i32, i32
  }
  func.func @transform_3(%arg0: i32) -> (i32, i32) {
    %c0_i32 = arith.constant 0 : i32
    %c0_i32_0 = arith.constant 0 : i32
    %c0_i32_1 = arith.constant 0 : i32
    return %c0_i32, %c0_i32_0 : i32, i32
  }
  func.func @transform_4(%arg0: i32) -> (i32, i32) {
    %c0_i32 = arith.constant 0 : i32
    %c0_i32_0 = arith.constant 0 : i32
    %c0_i32_1 = arith.constant 0 : i32
    return %c0_i32, %c0_i32_0 : i32, i32
  }
  func.func @transform_5(%arg0: i32) -> (i32, i32) {
    %c0_i32 = arith.constant 0 : i32
    %c0_i32_0 = arith.constant 0 : i32
    return %arg0, %c0_i32 : i32, i32
  }
}

</mosaic_0001>

<bundles_post_ra>
// kernel: branch_net_packed.1
= control target key start
LH: loop header
LB: loop body
LE: loop exit
PB: predicated region body
PF: predicated region fallthrough
CT: control target
= control target key end

     0   :  { %v1732_v0 = vmov 0.0   ;;  %vm36_vm0 = vcmask 523264   ;;  %vm1733_vm1 = vmmov 0   ;;  %vm1242_vm2 = vcmask 254976   ;;  %s2403_s1 = inlined_call_operand.vmem [shape: f32[64,128], index: 1, kind: input, shape index: {}]   ;;  %s2404_s0 = inlined_call_operand.vmem [shape: f32[2,64], index: 0, kind: input, shape index: {}]   ;;  %s2405_s3 = inlined_call_operand.vmem [shape: f32[128,32], index: 3, kind: input, shape index: {}]   ;;  %s2406_s2 = inlined_call_operand.vmem [shape: f32[1,128], index: 2, kind: input, shape index: {}]   ;;  %s2407_s4 = inlined_call_operand.vmem [shape: f32[1,32], index: 4, kind: input, shape index: {}]   ;;  %s2408_s5 = inlined_call_operand.vmem [shape: f32[2,32], index: 5, kind: output, shape index: {}]  }
   0x1   :  { %1406 = vmatprep.subr.mxu0 %v1732_v0  ;;  %v28_v1 = vld [vmem:[%s2403_s1 + $0x38] sm:$0xff]  ;;  %v27_v2 = vld [vmem:[%s2403_s1 + $0x30] sm:$0xff]  ;;  %v26_v3 = vld [vmem:[%s2403_s1 + $0x28] sm:$0xff]  ;;  %1425 = vmatprep.subr.mxu1 %v1732_v0 }
   0x2   :  { %v1775_v4 = vand.u32 4294901760, %v28_v1  ;;  %v1777_v5 = vand.u32 4294901760, %v27_v2  ;;  %v1779_v6 = vand.u32 4294901760, %v26_v3  ;;  %v25_v7 = vld [vmem:[%s2403_s1 + $0x20] sm:$0xff]  ;;  %v24_v8 = vld [vmem:[%s2403_s1 + $0x18] sm:$0xff]  ;;  %v23_v9 = vld [vmem:[%s2403_s1 + $0x10] sm:$0xff]  ;;  %1422 = vmatprep.mubr.msk.f32.mxu0 %vm1733_vm1, %v1732_v0  ;;  %1441 = vmatprep.mubr.msk.f32.mxu1 %vm1733_vm1, %v1732_v0 }
   0x3   :  { %v1794_v10 = vand.u32 4294901760, %v25_v7  ;;  %v1796_v11 = vand.u32 4294901760, %v24_v8  ;;  %v1798_v12 = vand.u32 4294901760, %v23_v9  ;;  %v22_v13 = vld [vmem:[%s2403_s1 + $0x8] sm:$0xff]  ;;  %v21_v14 = vld [vmem:[%s2403_s1] sm:$0xff]  ;;  %v593_v56 = vld [vmem:[%s2405_s3 + $0x78] sm:$0xff] }
   0x4   :  { %1407 = vmatpush3.msra.mxu0 %v1775_v4  ;;  %v1808_v15 = vsub.f32 %v28_v1, %v1775_v4  ;;  %v1811_v16 = vsub.f32 %v27_v2, %v1777_v5  ;;  %v1813_v17 = vand.u32 4294901760, %v22_v13  ;;  %v1816_v18 = vsub.f32 %v26_v3, %v1779_v6  ;;  %v20_v19 = vld [vmem:[%s2404_s0] sm:$0x3]  ;;  %v592_v58 = vld [vmem:[%s2405_s3 + $0x70] sm:$0xff]  ;;  %v591_v61 = vld [vmem:[%s2405_s3 + $0x68] sm:$0xff] }
   0x5   :  { %1408 = vmatprep.subr.mxu0 %v1732_v0  ;;  %v1822_v20 = vand.u32 4294901760, %v21_v14  ;;  %v1825_v21 = vsub.f32 %v25_v7, %v1794_v10  ;;  %v38_v22 = vsel %vm36_vm0, %v20_v19, 0  ;;  %v1829_v23 = vsub.f32 %v24_v8, %v1796_v11  ;;  %v590_v2 = vld [vmem:[%s2405_s3 + $0x60] sm:$0xff]  ;;  %v589_v7 = vld [vmem:[%s2405_s3 + $0x58] sm:$0xff]  ;;  %v587_v19 = vld [vmem:[%s2405_s3 + $0x48] sm:$0xff] }
   0x6   :  { %1409 = vmatpush3.msra.mxu0 %v1777_v5  ;;  %v142_v24 = vand.u32 4294901760, %v1808_v15  ;;  %v149_v25 = vand.u32 4294901760, %v1811_v16  ;;  %v156_v26 = vand.u32 4294901760, %v1816_v18  ;;  %v1835_v27 = vand.u32 4294901760, %v38_v22 }
   0x7   :  { %1410 = vmatprep.subr.mxu0 %v1732_v0  ;;  %v163_v28 = vand.u32 4294901760, %v1825_v21  ;;  %v170_v29 = vand.u32 4294901760, %v1829_v23  ;;  %v1841_v30 = vsub.f32 %v23_v9, %v1798_v12  ;;  %v1844_v31 = vsub.f32 %v22_v13, %v1813_v17  ;;  %v588_v13 = vld [vmem:[%s2405_s3 + $0x50] sm:$0xff] }
   0x8   :  { %1411 = vmatpush3.msra.mxu0 %v1779_v6  ;;  %v143_v32 = vsub.f32 %v1808_v15, %v142_v24  ;;  %v150_v33 = vsub.f32 %v1811_v16, %v149_v25  ;;  %v157_v34 = vsub.f32 %v1816_v18, %v156_v26  ;;  %v1857_v35 = vsub.f32 %v38_v22, %v1835_v27 }
   0x9   :  { %1412 = vmatprep.subr.mxu0 %v1732_v0  ;;  %v164_v36 = vsub.f32 %v1825_v21, %v163_v28  ;;  %v177_v40 = vand.u32 4294901760, %v1841_v30  ;;  %v171_v41 = vsub.f32 %v1829_v23, %v170_v29  ;;  %v184_v44 = vand.u32 4294901760, %v1844_v31 }
   0xa   :  { %1413 = vmatpush3.msra.mxu0 %v1794_v10  ;;  %v144_v37 = vand.u32 4294901760, %v143_v32  ;;  %v151_v38 = vand.u32 4294901760, %v150_v33  ;;  %v115_v39 = vand.u32 4294901760, %v1857_v35  ;;  %v158_v42 = vand.u32 4294901760, %v157_v34 }
   0xb   :  { %1414 = vmatprep.subr.mxu0 %v1732_v0  ;;  %v1876_v45 = vsub.f32 %v21_v14, %v1822_v20  ;;  %v165_v46 = vand.u32 4294901760, %v164_v36  ;;  %v178_v47 = vsub.f32 %v1841_v30, %v177_v40  ;;  %v172_v50 = vand.u32 4294901760, %v171_v41 }
   0xc   :  { %1415 = vmatpush3.msra.mxu0 %v1796_v11  ;;  %1426 = vmatpush3.msra.mxu1 %v144_v37  ;;  %v116_v43 = vsub.f32 %v1857_v35, %v115_v39  ;;  %v185_v51 = vsub.f32 %v1844_v31, %v184_v44  ;;  %v1996_v57 = vand.u32 4294901760, %v593_v56  ;;  %v2004_v60 = vand.u32 4294901760, %v592_v58  ;;  %v584_v37 = vld [vmem:[%s2405_s3 + $0x30] sm:$0xff] }
   0xd   :  { %1416 = vmatprep.subr.mxu0 %v1732_v0  ;;  %1427 = vmatprep.subr.mxu1 %v1732_v0  ;;  %v191_v48 = vand.u32 4294901760, %v1876_v45  ;;  %v179_v52 = vand.u32 4294901760, %v178_v47  ;;  %v2015_v1 = vand.u32 4294901760, %v591_v61 }
   0xe   :  { %1417 = vmatpush3.msra.mxu0 %v1798_v12  ;;  %1428 = vmatpush3.msra.mxu1 %v151_v38  ;;  %v117_v49 = vand.u32 4294901760, %v116_v43  ;;  %v186_v54 = vand.u32 4294901760, %v185_v51  ;;  %v2002_v59 = vsub.f32 %v593_v56, %v1996_v57  ;;  %v2013_v63 = vsub.f32 %v592_v58, %v2004_v60  ;;  %v583_v43 = vld [vmem:[%s2405_s3 + $0x28] sm:$0xff] }
   0xf   :  { %1418 = vmatprep.subr.mxu0 %v1732_v0  ;;  %1429 = vmatprep.subr.mxu1 %v1732_v0  ;;  %v192_v53 = vsub.f32 %v1876_v45, %v191_v48  ;;  %v2128_v47 = vand.u32 4294901760, %v583_v43 }
  0x10   :  { %1419 = vmatpush3.msra.mxu0 %v1813_v17  ;;  %1430 = vmatpush3.msra.mxu1 %v158_v42  ;;  %v695_v62 = vand.u32 4294901760, %v2002_v59  ;;  %v2117_v42 = vand.u32 4294901760, %v584_v37 }
  0x11   :  { %1420 = vmatprep.subr.mxu0 %v1732_v0  ;;  %1431 = vmatprep.subr.mxu1 %v1732_v0  ;;  %v193_v55 = vand.u32 4294901760, %v192_v53 }
  0x12   :  { %1421 = vmatpush3.msra.mxu0 %v1822_v20  ;;  %1432 = vmatpush3.msra.mxu1 %v165_v46  ;;  %v696_v3 = vsub.f32 %v2002_v59, %v695_v62 }
  0x13   :  { %1433 = vmatprep.subr.mxu1 %v1732_v0  ;;  %1444 = vmatprep.subr.mxu0 %v1732_v0 }
  0x14   :  { %1423 = vmatmul.mubr.f32.vlgmr.msra.gmra.mxu0 %v117_v49  ;;  %1434 = vmatpush3.msra.mxu1 %v172_v50  ;;  %v697_v8 = vand.u32 4294901760, %v696_v3  ;;  %v582_v49 = vld [vmem:[%s2405_s3 + $0x20] sm:$0xff] }
  0x15   :  { %1445 = vmatpush3.msra.mxu0 %v1808_v15  ;;  %1435 = vmatprep.subr.mxu1 %v1732_v0  ;;  %v2145_v53 = vand.u32 4294901760, %v582_v49 }
  0x16   :  { %1446 = vmatprep.subr.mxu0 %v1732_v0  ;;  %1436 = vmatpush3.msra.mxu1 %v179_v52  ;;  %v2143_v52 = vsub.f32 %v583_v43, %v2128_v47 }
  0x17   :  { %1447 = vmatpush3.msra.mxu0 %v1811_v16  ;;  %1437 = vmatprep.subr.mxu1 %v1732_v0 }
  0x18   :  { %1448 = vmatprep.subr.mxu0 %v1732_v0  ;;  %1438 = vmatpush3.msra.mxu1 %v186_v54  ;;  %v765_v58 = vand.u32 4294901760, %v2143_v52 }
  0x19   :  { %1449 = vmatpush3.msra.mxu0 %v1816_v18  ;;  %1439 = vmatprep.subr.mxu1 %v1732_v0 }
  0x1a   :  { %1450 = vmatprep.subr.mxu0 %v1732_v0  ;;  %1440 = vmatpush3.msra.mxu1 %v193_v55  ;;  %v581_v55 = vld [vmem:[%s2405_s3 + $0x18] sm:$0xff] }
  0x1b   :  { %1451 = vmatpush3.msra.mxu0 %v1825_v21  ;;  %1442 = vmatmul.mubr.f32.vlgmr.msra.gmra.mxu1 %v1835_v27 }
  0x1c   :  { %1452 = vmatprep.subr.mxu0 %v1732_v0  ;;  %1463 = vmatprep.subr.mxu1 %v1732_v0 }
  0x1d   :  { %1453 = vmatpush3.msra.mxu0 %v1829_v23  ;;  %1464 = vmatpush3.msra.mxu1 %v1775_v4  ;;  %v2070_v23 = vand.u32 4294901760, %v587_v19 }
  0x1e   :  { %1454 = vmatprep.subr.mxu0 %v1732_v0  ;;  %1465 = vmatprep.subr.mxu1 %v1732_v0 }
  0x1f   :  { %1455 = vmatpush3.msra.mxu0 %v1841_v30  ;;  %1466 = vmatpush3.msra.mxu1 %v1777_v5 }
  0x20   :  { %1456 = vmatprep.subr.mxu0 %v1732_v0  ;;  %1467 = vmatprep.subr.mxu1 %v1732_v0 }
  0x21   :  { %1457 = vmatpush3.msra.mxu0 %v1844_v31  ;;  %1468 = vmatpush3.msra.mxu1 %v1779_v6  ;;  %v585_v31 = vld [vmem:[%s2405_s3 + $0x38] sm:$0xff] }
  0x22   :  { %1458 = vmatprep.subr.mxu0 %v1732_v0  ;;  %1469 = vmatprep.subr.mxu1 %v1732_v0 }
  0x23   :  { %1459 = vmatpush3.msra.mxu0 %v1876_v45  ;;  %1460 = vmatprep.mubr.msk.f32.mxu0 %vm1733_vm1, %v1732_v0 }
  0x24   :  { %1470 = vmatpush3.msra.mxu1 %v1794_v10  ;;  %1461 = vmatmul.mubr.f32.vlgmr.msra.gmra.mxu0 %v1857_v35  ;;  %v2101_v35 = vand.u32 4294901760, %v585_v31 }
  0x25   :  { %1471 = vmatprep.subr.mxu1 %v1732_v0  ;;  %1482 = vmatprep.subr.mxu0 %v1732_v0 }
  0x26   :  { %1472 = vmatpush3.msra.mxu1 %v1796_v11  ;;  %1483 = vmatpush3.msra.mxu0 %v142_v24  ;;  %v2114_v41 = vsub.f32 %v585_v31, %v2101_v35  ;;  %v578_v31 = vld [vmem:[%s2405_s3] sm:$0xff] }
  0x27   :  { %1473 = vmatprep.subr.mxu1 %v1732_v0  ;;  %1484 = vmatprep.subr.mxu0 %v1732_v0 }
  0x28   :  { %1474 = vmatpush3.msra.mxu1 %v1798_v12  ;;  %1485 = vmatpush3.msra.mxu0 %v149_v25  ;;  %v586_v25 = vld [vmem:[%s2405_s3 + $0x40] sm:$0xff]  ;;  %v751_v46 = vand.u32 4294901760, %v2114_v41 }
  0x29   :  { %1475 = vmatprep.subr.mxu1 %v1732_v0  ;;  %1486 = vmatprep.subr.mxu0 %v1732_v0 }
  0x2a   :  { %1476 = vmatpush3.msra.mxu1 %v1813_v17  ;;  %1487 = vmatpush3.msra.mxu0 %v156_v26  ;;  %v752_v51 = vsub.f32 %v2114_v41, %v751_v46 }
  0x2b   :  { %1477 = vmatprep.subr.mxu1 %v1732_v0  ;;  %1488 = vmatprep.subr.mxu0 %v1732_v0 }
  0x2c   :  { %1478 = vmatpush3.msra.mxu1 %v1822_v20  ;;  %1479 = vmatprep.mubr.msk.f32.mxu1 %vm1733_vm1, %v1732_v0  ;;  %v753_v56 = vand.u32 4294901760, %v752_v51 }
  0x2d   :  { %1489 = vmatpush3.msra.mxu0 %v163_v28  ;;  %1480 = vmatmul.mubr.f32.vlgmr.msra.gmra.mxu1 %v115_v39  ;;  %v2081_v28 = vsub.f32 %v587_v19, %v2070_v23  ;;  %v579_v19 = vld [vmem:[%s2405_s3 + $0x8] sm:$0xff] }
  0x2e   :  { %1490 = vmatprep.subr.mxu0 %v1732_v0  ;;  %1501 = vmatprep.subr.mxu1 %v1732_v0 }
  0x2f   :  { %1491 = vmatpush3.msra.mxu0 %v170_v29  ;;  %1502 = vmatpush3.msra.mxu1 %v1775_v4  ;;  %v702_v4 = vand.u32 4294901760, %v2013_v63  ;;  %v2083_v29 = vand.u32 4294901760, %v586_v25  ;;  %v737_v33 = vand.u32 4294901760, %v2081_v28 }
  0x30   :  { %1492 = vmatprep.subr.mxu0 %v1732_v0  ;;  %1503 = vmatprep.subr.mxu1 %v1732_v0 }
  0x31   :  { %1493 = vmatpush3.msra.mxu0 %v177_v40  ;;  %1504 = vmatpush3.msra.mxu1 %v1777_v5  ;;  %v2027_v5 = vsub.f32 %v591_v61, %v2015_v1  ;;  %v703_v9 = vsub.f32 %v2013_v63, %v702_v4  ;;  %v2099_v34 = vsub.f32 %v586_v25, %v2083_v29 }
  0x32   :  { %1494 = vmatprep.subr.mxu0 %v1732_v0  ;;  %1505 = vmatprep.subr.mxu1 %v1732_v0  ;;  %v738_v39 = vsub.f32 %v2081_v28, %v737_v33  ;;  %v2156_v61 = vsub.f32 %v582_v49, %v2145_v53 }
  0x33   :  { %1495 = vmatpush3.msra.mxu0 %v184_v44  ;;  %1506 = vmatpush3.msra.mxu1 %v1779_v6  ;;  %v2029_v6 = vand.u32 4294901760, %v590_v2  ;;  %v704_v14 = vand.u32 4294901760, %v703_v9  ;;  %v744_v40 = vand.u32 4294901760, %v2099_v34 }
  0x34   :  { %1496 = vmatprep.subr.mxu0 %v1732_v0  ;;  %1507 = vmatprep.subr.mxu1 %v1732_v0  ;;  %v739_v44 = vand.u32 4294901760, %v738_v39  ;;  %v772_v9 = vand.u32 4294901760, %v2156_v61 }
  0x35   :  { %1497 = vmatpush3.msra.mxu0 %v191_v48  ;;  %1498 = vmatprep.mubr.msk.f32.mxu0 %vm1733_vm1, %v1732_v0  ;;  %v745_v45 = vsub.f32 %v2099_v34, %v744_v40  ;;  %v2132_v48 = vsub.f32 %v584_v37, %v2117_v42 }
  0x36   :  { %1508 = vmatpush3.msra.mxu1 %v1794_v10  ;;  %1499 = vmatmul.mubr.f32.vlgmr.msra.gmra.mxu0 %v1835_v27  ;;  %v709_v10 = vand.u32 4294901760, %v2027_v5 }
  0x37   :  { %1509 = vmatprep.subr.mxu1 %v1732_v0  ;;  %1517 = vmatprep.mubr.msk.f32.mxu1 %vm1733_vm1, %v1732_v0  ;;  %v746_v50 = vand.u32 4294901760, %v745_v45  ;;  %v758_v54 = vand.u32 4294901760, %v2132_v48 }
  0x38   :  { %1510 = vmatpush3.msra.mxu1 %v1796_v11  ;;  %1520 = vmatprep.subr.mxu0 %v1732_v0  ;;  %v2041_v11 = vsub.f32 %v590_v2, %v2029_v6  ;;  %v710_v15 = vsub.f32 %v2027_v5, %v709_v10  ;;  %v2158_v2 = vand.u32 4294901760, %v581_v55 }
  0x39   :  { %1511 = vmatprep.subr.mxu1 %v1732_v0  ;;  %1552 = vmatprep.mubr.msk.f32.mxu0 %vm1733_vm1, %v1732_v0  ;;  %v759_v3 = vsub.f32 %v2132_v48, %v758_v54 }
  0x3a   :  { %1512 = vmatpush3.msra.mxu1 %v1798_v12  ;;  %1521 = vmatpush3.msra.mxu0 %v1996_v57  ;;  %v2044_v12 = vand.u32 4294901760, %v589_v7  ;;  %v716_v16 = vand.u32 4294901760, %v2041_v11 }
  0x3b   :  { %1513 = vmatprep.subr.mxu1 %v1732_v0  ;;  %1522 = vmatprep.subr.mxu0 %v1732_v0 }
  0x3c   :  { %1514 = vmatpush3.msra.mxu1 %v1813_v17  ;;  %1523 = vmatpush3.msra.mxu0 %v2004_v60  ;;  %v2054_v17 = vand.u32 4294901760, %v588_v13  ;;  %v2058_v18 = vsub.f32 %v589_v7, %v2044_v12  ;;  %v717_v21 = vsub.f32 %v2041_v11, %v716_v16  ;;  %v580_v7 = vld [vmem:[%s2405_s3 + $0x10] sm:$0xff] }
  0x3d   :  { %1515 = vmatprep.subr.mxu1 %v1732_v0  ;;  %1524 = vmatprep.subr.mxu0 %v1732_v0 }
  0x3e   :  { %1516 = vmatpush3.msra.mxu1 %v1822_v20  ;;  %1525 = vmatpush3.msra.mxu0 %v2015_v1  ;;  %v711_v20 = vand.u32 4294901760, %v710_v15  ;;  %v2068_v22 = vsub.f32 %v588_v13, %v2054_v17  ;;  %v723_v24 = vand.u32 4294901760, %v2058_v18  ;;  %v718_v26 = vand.u32 4294901760, %v717_v21 }
  0x3f   :  { %1518 = vmatmul.mubr.f32.vlgmr.msra.gmra.mxu1 %v1835_v27  ;;  %1555 = vmatprep.subr.mxu1 %v1732_v0  ;;  %v2174_v13 = vsub.f32 %v581_v55, %v2158_v2  ;;  %v760_v15 = vand.u32 4294901760, %v759_v3  ;;  %v773_v21 = vsub.f32 %v2156_v61, %v772_v9 }
  0x40   :  { %1587 = vmatprep.mubr.msk.f32.mxu1 %vm1733_vm1, %v1732_v0  ;;  %1526 = vmatprep.subr.mxu0 %v1732_v0  ;;  %v730_v27 = vand.u32 4294901760, %v2068_v22  ;;  %v724_v30 = vsub.f32 %v2058_v18, %v723_v24 }
  0x41   :  { %1527 = vmatpush3.msra.mxu0 %v2029_v6  ;;  %1556 = vmatpush3.msra.mxu1 %v697_v8  ;;  %v766_v8 = vsub.f32 %v2143_v52, %v765_v58  ;;  %v2412_v25 = vand.u32 4294901760, %v2174_v13 }
  0x42   :  { %1528 = vmatprep.subr.mxu0 %v1732_v0  ;;  %1557 = vmatprep.subr.mxu1 %v1732_v0  ;;  %v731_v32 = vsub.f32 %v2068_v22, %v730_v27  ;;  %v725_v36 = vand.u32 4294901760, %v724_v30  ;;  %v2192_v30 = vand.u32 4294901760, %v579_v19 }
  0x43   :  { %1529 = vmatpush3.msra.mxu0 %v2044_v12  ;;  %1558 = vmatpush3.msra.mxu1 %v704_v14  ;;  %v2176_v14 = vand.u32 4294901760, %v580_v7 }
  0x44   :  { %1530 = vmatprep.subr.mxu0 %v1732_v0  ;;  %1559 = vmatprep.subr.mxu1 %v1732_v0  ;;  %v732_v38 = vand.u32 4294901760, %v731_v32  ;;  %v774_v32 = vand.u32 4294901760, %v773_v21  ;;  %v2207_v39 = vsub.f32 %v579_v19, %v2192_v30 }
  0x45   :  { %1531 = vmatpush3.msra.mxu0 %v2054_v17  ;;  %1560 = vmatpush3.msra.mxu1 %v711_v20  ;;  %v767_v20 = vand.u32 4294901760, %v766_v8 }
  0x46   :  { %1532 = vmatprep.subr.mxu0 %v1732_v0  ;;  %1561 = vmatprep.subr.mxu1 %v1732_v0  ;;  %v2410_v49 = vand.u32 4294901760, %v2207_v39 }
  0x47   :  { %1533 = vmatpush3.msra.mxu0 %v2070_v23  ;;  %1562 = vmatpush3.msra.mxu1 %v718_v26  ;;  %v2189_v26 = vsub.f32 %v580_v7, %v2176_v14 }
  0x48   :  { %1534 = vmatprep.subr.mxu0 %v1732_v0  ;;  %1563 = vmatprep.subr.mxu1 %v1732_v0  ;;  %v794_v55 = vsub.f32 %v2207_v39, %v2410_v49 }
  0x49   :  { %1535 = vmatpush3.msra.mxu0 %v2083_v29  ;;  %1564 = vmatpush3.msra.mxu1 %v725_v36  ;;  %v780_v36 = vsub.f32 %v2174_v13, %v2412_v25  ;;  %v2411_v37 = vand.u32 4294901760, %v2189_v26 }
  0x4a   :  { %1536 = vmatprep.subr.mxu0 %v1732_v0  ;;  %1565 = vmatprep.subr.mxu1 %v1732_v0  ;;  %v795_v3 = vand.u32 4294901760, %v794_v55 }
  0x4b   :  { %1537 = vmatpush3.msra.mxu0 %v2101_v35  ;;  %1566 = vmatpush3.msra.mxu1 %v732_v38  ;;  %v2203_v38 = vand.u32 4294901760, %v578_v31  ;;  %v781_v43 = vand.u32 4294901760, %v780_v36 }
  0x4c   :  { %1538 = vmatprep.subr.mxu0 %v1732_v0  ;;  %1567 = vmatprep.subr.mxu1 %v1732_v0 }
  0x4d   :  { %1539 = vmatpush3.msra.mxu0 %v2117_v42  ;;  %1568 = vmatpush3.msra.mxu1 %v739_v44  ;;  %v787_v44 = vsub.f32 %v2189_v26, %v2411_v37  ;;  %v2215_v45 = vsub.f32 %v578_v31, %v2203_v38 }
  0x4e   :  { %1540 = vmatprep.subr.mxu0 %v1732_v0  ;;  %1569 = vmatprep.subr.mxu1 %v1732_v0 }
  0x4f   :  { %1541 = vmatpush3.msra.mxu0 %v2128_v47  ;;  %1570 = vmatpush3.msra.mxu1 %v746_v50  ;;  %v788_v50 = vand.u32 4294901760, %v787_v44  ;;  %v2409_v51 = vand.u32 4294901760, %v2215_v45 }
  0x50   :  { %1542 = vmatprep.subr.mxu0 %v1732_v0  ;;  %1571 = vmatprep.subr.mxu1 %v1732_v0 }
  0x51   :  { %1543 = vmatpush3.msra.mxu0 %v2145_v53  ;;  %1572 = vmatpush3.msra.mxu1 %v753_v56  ;;  %v801_v56 = vsub.f32 %v2215_v45, %v2409_v51 }
  0x52   :  { %1544 = vmatprep.subr.mxu0 %v1732_v0  ;;  %1573 = vmatprep.subr.mxu1 %v1732_v0 }
  0x53   :  { %1545 = vmatpush3.msra.mxu0 %v2158_v2  ;;  %1574 = vmatpush3.msra.mxu1 %v760_v15  ;;  %v802_v7 = vand.u32 4294901760, %v801_v56 }
  0x54   :  { %1546 = vmatprep.subr.mxu0 %v1732_v0  ;;  %1575 = vmatprep.subr.mxu1 %v1732_v0 }
  0x55   :  { %1547 = vmatpush3.msra.mxu0 %v2176_v14  ;;  %1576 = vmatpush3.msra.mxu1 %v767_v20 }
  0x56   :  { %1548 = vmatprep.subr.mxu0 %v1732_v0  ;;  %1577 = vmatprep.subr.mxu1 %v1732_v0 }
  0x57   :  { %1549 = vmatpush3.msra.mxu0 %v2192_v30  ;;  %1578 = vmatpush3.msra.mxu1 %v774_v32 }
  0x58   :  { %1550 = vmatprep.subr.mxu0 %v1732_v0  ;;  %1579 = vmatprep.subr.mxu1 %v1732_v0 }
  0x59   :  { %1551 = vmatpush3.msra.mxu0 %v2203_v38  ;;  %1580 = vmatpush3.msra.mxu1 %v781_v43  ;;  %v1248_v43 = vld [vmem:[%s2406_s2] ss:$0 sm:$0xff] }
  0x5a   :  { %1590 = vmatprep.subr.mxu0 %v1732_v0  ;;  %1581 = vmatprep.subr.mxu1 %v1732_v0 }
  0x5b   :  { %1582 = vmatpush3.msra.mxu1 %v788_v50 }
  0x5c   :  { %1583 = vmatprep.subr.mxu1 %v1732_v0 }
  0x5d   :  { %1584 = vmatpush3.msra.mxu1 %v795_v3 }
  0x5e   :  { %1585 = vmatprep.subr.mxu1 %v1732_v0 }
  0x5f   :  { %1586 = vmatpush3.msra.mxu1 %v802_v7 }
  0x60   :  { %1625 = vmatprep.subr.mxu1 %v1732_v0 }
  0xd4   :  { %v119_v8 = vpop.f32.mrf.mxu0 }
  0xd5   :  { %v120_v44 = vadd.f32 %v1248_v43, %v119_v8 }
  0xd6   :  { %v1424_v15 = vpop.f32.mrf.mxu0 }
  0xdb   :  { %v230_v19 = vpop.f32.mrf.mxu1 }
  0xdc   :  { %v231_v55 = vadd.f32 %v230_v19, %v120_v44 }
  0xdd   :  { %v1443_v20 = vpop.f32.mrf.mxu1 }
  0xe4   :  { %v318_v21 = vpop.f32.mrf.mxu0 }
  0xe5   :  { %v319_v3 = vadd.f32 %v318_v21, %v231_v55 }
  0xe6   :  { %v1462_v31 = vpop.f32.mrf.mxu0 }
  0xed   :  { %v399_v32 = vpop.f32.mrf.mxu1 }
  0xee   :  { %v400_v7 = vadd.f32 %v399_v32, %v319_v3 }
  0xef   :  { %v1481_v36 = vpop.f32.mrf.mxu1 }
  0xf6   :  { %v494_v50 = vpop.f32.mrf.mxu0 }
  0xf7   :  { %v495_v51 = vadd.f32 %v494_v50, %v400_v7 }
  0xf8   :  { %v1500_v56 = vpop.f32.mrf.mxu0 }
  0xff   :  { %v573_v49 = vpop.f32.mrf.mxu1 }
 0x100   :  { %v574_v37 = vadd.f32 %v573_v49, %v495_v51 }
 0x101   :  { %v1519_v15 = vpop.f32.mrf.mxu1 }
 0x102   :  { %v577_v25 = vmax.f32 %v574_v37, 0.0 }
 0x104   :  { %v2236_v20 = vand.u32 4294901760, %v577_v25 }
 0x106   :  { %v2239_v31 = vsub.f32 %v577_v25, %v2236_v20  ;;  %1588 = vmatmul.mubr.f32.vlgmr.msra.gmra.mxu1 %v2236_v20 }
 0x107   :  { %1626 = vmatpush3.msra.mxu1 %v1996_v57  ;;  %1657 = vmatprep.mubr.msk.f32.mxu1 %vm1733_vm1, %v1732_v0 }
 0x108   :  { %v684_v8 = vand.u32 4294901760, %v2239_v31  ;;  %1627 = vmatprep.subr.mxu1 %v1732_v0 }
 0x109   :  { %1628 = vmatpush3.msra.mxu1 %v2004_v60 }
 0x10a   :  { %v685_v37 = vsub.f32 %v2239_v31, %v684_v8  ;;  %1629 = vmatprep.subr.mxu1 %v1732_v0 }
 0x10b   :  { %1630 = vmatpush3.msra.mxu1 %v2015_v1 }
 0x10c   :  { %1631 = vmatprep.subr.mxu1 %v1732_v0  ;;  %v686_v25 = vand.u32 4294901760, %v685_v37 }
 0x10d   :  { %1632 = vmatpush3.msra.mxu1 %v2029_v6 }
 0x10e   :  { %1633 = vmatprep.subr.mxu1 %v1732_v0  ;;  %1553 = vmatmul.mubr.f32.vlgmr.msra.gmra.mxu0 %v686_v25 }
 0x10f   :  { %1591 = vmatpush3.msra.mxu0 %v2002_v59  ;;  %1634 = vmatpush3.msra.mxu1 %v2044_v12  ;;  %v2414_v59 = vand.u32 4294901760, %v2189_v26 }
 0x110   :  { %1592 = vmatprep.subr.mxu0 %v1732_v0  ;;  %1635 = vmatprep.subr.mxu1 %v1732_v0 }
 0x111   :  { %1593 = vmatpush3.msra.mxu0 %v2013_v63  ;;  %1636 = vmatpush3.msra.mxu1 %v2054_v17 }
 0x112   :  { %1594 = vmatprep.subr.mxu0 %v1732_v0  ;;  %1637 = vmatprep.subr.mxu1 %v1732_v0 }
 0x113   :  { %1595 = vmatpush3.msra.mxu0 %v2027_v5  ;;  %1638 = vmatpush3.msra.mxu1 %v2070_v23 }
 0x114   :  { %1596 = vmatprep.subr.mxu0 %v1732_v0  ;;  %1639 = vmatprep.subr.mxu1 %v1732_v0 }
 0x115   :  { %1597 = vmatpush3.msra.mxu0 %v2041_v11  ;;  %1640 = vmatpush3.msra.mxu1 %v2083_v29 }
 0x116   :  { %1598 = vmatprep.subr.mxu0 %v1732_v0  ;;  %1641 = vmatprep.subr.mxu1 %v1732_v0 }
 0x117   :  { %1599 = vmatpush3.msra.mxu0 %v2058_v18  ;;  %1642 = vmatpush3.msra.mxu1 %v2101_v35 }
 0x118   :  { %1600 = vmatprep.subr.mxu0 %v1732_v0  ;;  %1643 = vmatprep.subr.mxu1 %v1732_v0 }
 0x119   :  { %1601 = vmatpush3.msra.mxu0 %v2068_v22  ;;  %1644 = vmatpush3.msra.mxu1 %v2117_v42 }
 0x11a   :  { %1602 = vmatprep.subr.mxu0 %v1732_v0  ;;  %1645 = vmatprep.subr.mxu1 %v1732_v0 }
 0x11b   :  { %1603 = vmatpush3.msra.mxu0 %v2081_v28  ;;  %1646 = vmatpush3.msra.mxu1 %v2128_v47 }
 0x11c   :  { %1604 = vmatprep.subr.mxu0 %v1732_v0  ;;  %1647 = vmatprep.subr.mxu1 %v1732_v0 }
 0x11d   :  { %1605 = vmatpush3.msra.mxu0 %v2099_v34  ;;  %1648 = vmatpush3.msra.mxu1 %v2145_v53 }
 0x11e   :  { %1606 = vmatprep.subr.mxu0 %v1732_v0  ;;  %1649 = vmatprep.subr.mxu1 %v1732_v0 }
 0x11f   :  { %1607 = vmatpush3.msra.mxu0 %v2114_v41  ;;  %1650 = vmatpush3.msra.mxu1 %v2158_v2 }
 0x120   :  { %1608 = vmatprep.subr.mxu0 %v1732_v0  ;;  %1651 = vmatprep.subr.mxu1 %v1732_v0 }
 0x121   :  { %1609 = vmatpush3.msra.mxu0 %v2132_v48  ;;  %1652 = vmatpush3.msra.mxu1 %v2176_v14 }
 0x122   :  { %1610 = vmatprep.subr.mxu0 %v1732_v0  ;;  %1653 = vmatprep.subr.mxu1 %v1732_v0 }
 0x123   :  { %1611 = vmatpush3.msra.mxu0 %v2143_v52  ;;  %1654 = vmatpush3.msra.mxu1 %v2192_v30 }
 0x124   :  { %1612 = vmatprep.subr.mxu0 %v1732_v0  ;;  %1655 = vmatprep.subr.mxu1 %v1732_v0 }
 0x125   :  { %1613 = vmatpush3.msra.mxu0 %v2156_v61  ;;  %1656 = vmatpush3.msra.mxu1 %v2203_v38 }
 0x126   :  { %1614 = vmatprep.subr.mxu0 %v1732_v0  ;;  %1658 = vmatmul.mubr.f32.vlgmr.msra.gmra.mxu1 %v684_v8 }
 0x127   :  { %1695 = vmatprep.subr.mxu1 %v1732_v0  ;;  %1615 = vmatpush3.msra.mxu0 %v2174_v13 }
 0x128   :  { %1696 = vmatpush3.msra.mxu1 %v1996_v57  ;;  %1616 = vmatprep.subr.mxu0 %v1732_v0  ;;  %v2413_v57 = vand.u32 4294901760, %v2174_v13 }
 0x129   :  { %1697 = vmatprep.subr.mxu1 %v1732_v0  ;;  %1617 = vmatpush3.msra.mxu0 %v2189_v26 }
 0x12a   :  { %1698 = vmatpush3.msra.mxu1 %v2004_v60  ;;  %1618 = vmatprep.subr.mxu0 %v1732_v0  ;;  %v2415_v60 = vand.u32 4294901760, %v2207_v39 }
 0x12b   :  { %1699 = vmatprep.subr.mxu1 %v1732_v0  ;;  %1619 = vmatpush3.msra.mxu0 %v2207_v39 }
 0x12c   :  { %1700 = vmatpush3.msra.mxu1 %v2015_v1  ;;  %1620 = vmatprep.subr.mxu0 %v1732_v0 }
 0x12d   :  { %1701 = vmatprep.subr.mxu1 %v1732_v0  ;;  %1621 = vmatpush3.msra.mxu0 %v2215_v45 }
 0x12e   :  { %1622 = vmatprep.mubr.msk.f32.mxu0 %vm1733_vm1, %v1732_v0  ;;  %1702 = vmatpush3.msra.mxu1 %v2029_v6 }
 0x12f   :  { %1623 = vmatmul.mubr.f32.vlgmr.msra.gmra.mxu0 %v2239_v31  ;;  %1660 = vmatprep.subr.mxu0 %v1732_v0 }
 0x130   :  { %1703 = vmatprep.subr.mxu1 %v1732_v0  ;;  %1661 = vmatpush3.msra.mxu0 %v695_v62  ;;  %v2416_v62 = vand.u32 4294901760, %v2215_v45 }
 0x131   :  { %1704 = vmatpush3.msra.mxu1 %v2044_v12  ;;  %1662 = vmatprep.subr.mxu0 %v1732_v0 }
 0x132   :  { %1705 = vmatprep.subr.mxu1 %v1732_v0  ;;  %1663 = vmatpush3.msra.mxu0 %v702_v4 }
 0x133   :  { %1706 = vmatpush3.msra.mxu1 %v2054_v17  ;;  %1664 = vmatprep.subr.mxu0 %v1732_v0 }
 0x134   :  { %1707 = vmatprep.subr.mxu1 %v1732_v0  ;;  %1665 = vmatpush3.msra.mxu0 %v709_v10 }
 0x135   :  { %1708 = vmatpush3.msra.mxu1 %v2070_v23  ;;  %1666 = vmatprep.subr.mxu0 %v1732_v0 }
 0x136   :  { %1709 = vmatprep.subr.mxu1 %v1732_v0  ;;  %1667 = vmatpush3.msra.mxu0 %v716_v16  ;;  %v1249_v16 = vld [vmem:[%s2407_s4] ss:$0 sm:$0xff] }
 0x137   :  { %1710 = vmatpush3.msra.mxu1 %v2083_v29  ;;  %1668 = vmatprep.subr.mxu0 %v1732_v0 }
 0x138   :  { %1711 = vmatprep.subr.mxu1 %v1732_v0  ;;  %1669 = vmatpush3.msra.mxu0 %v723_v24 }
 0x139   :  { %1712 = vmatpush3.msra.mxu1 %v2101_v35  ;;  %1670 = vmatprep.subr.mxu0 %v1732_v0 }
 0x13a   :  { %1713 = vmatprep.subr.mxu1 %v1732_v0  ;;  %1671 = vmatpush3.msra.mxu0 %v730_v27 }
 0x13b   :  { %1714 = vmatpush3.msra.mxu1 %v2117_v42  ;;  %1672 = vmatprep.subr.mxu0 %v1732_v0 }
 0x13c   :  { %1715 = vmatprep.subr.mxu1 %v1732_v0  ;;  %1673 = vmatpush3.msra.mxu0 %v737_v33 }
 0x13d   :  { %1716 = vmatpush3.msra.mxu1 %v2128_v47  ;;  %1674 = vmatprep.subr.mxu0 %v1732_v0 }
 0x13e   :  { %1717 = vmatprep.subr.mxu1 %v1732_v0  ;;  %1675 = vmatpush3.msra.mxu0 %v744_v40 }
 0x13f   :  { %1718 = vmatpush3.msra.mxu1 %v2145_v53  ;;  %1676 = vmatprep.subr.mxu0 %v1732_v0 }
 0x140   :  { %1719 = vmatprep.subr.mxu1 %v1732_v0  ;;  %1677 = vmatpush3.msra.mxu0 %v751_v46 }
 0x141   :  { %1720 = vmatpush3.msra.mxu1 %v2158_v2  ;;  %1678 = vmatprep.subr.mxu0 %v1732_v0 }
 0x142   :  { %1721 = vmatprep.subr.mxu1 %v1732_v0  ;;  %1679 = vmatpush3.msra.mxu0 %v758_v54 }
 0x143   :  { %1722 = vmatpush3.msra.mxu1 %v2176_v14  ;;  %1680 = vmatprep.subr.mxu0 %v1732_v0 }
 0x144   :  { %1723 = vmatprep.subr.mxu1 %v1732_v0  ;;  %1681 = vmatpush3.msra.mxu0 %v765_v58 }
 0x145   :  { %1724 = vmatpush3.msra.mxu1 %v2192_v30  ;;  %1682 = vmatprep.subr.mxu0 %v1732_v0 }
 0x146   :  { %1725 = vmatprep.subr.mxu1 %v1732_v0  ;;  %1683 = vmatpush3.msra.mxu0 %v772_v9 }
 0x147   :  { %1726 = vmatpush3.msra.mxu1 %v2203_v38  ;;  %1727 = vmatprep.mubr.msk.f32.mxu1 %vm1733_vm1, %v1732_v0 }
 0x148   :  { %1684 = vmatprep.subr.mxu0 %v1732_v0  ;;  %1728 = vmatmul.mubr.f32.vlgmr.msra.gmra.mxu1 %v2236_v20 }
 0x149   :  { %1685 = vmatpush3.msra.mxu0 %v2413_v57  ;;  %1692 = vmatprep.mubr.msk.f32.mxu0 %vm1733_vm1, %v1732_v0 }
 0x14a   :  { %1686 = vmatprep.subr.mxu0 %v1732_v0 }
 0x14b   :  { %1687 = vmatpush3.msra.mxu0 %v2414_v59 }
 0x14c   :  { %1688 = vmatprep.subr.mxu0 %v1732_v0 }
 0x14d   :  { %1689 = vmatpush3.msra.mxu0 %v2415_v60 }
 0x14e   :  { %1690 = vmatprep.subr.mxu0 %v1732_v0 }
 0x14f   :  { %1691 = vmatpush3.msra.mxu0 %v2416_v62 }
 0x150   :  { %1693 = vmatmul.mubr.f32.vlgmr.msra.gmra.mxu0 %v2236_v20 }
 0x1c6   :  { %v839_v63 = vpop.f32.mrf.mxu1 }
 0x1c8   :  { %v1589_v1 = vpop.f32.mrf.mxu1 }
 0x1ce   :  { %v688_v4 = vpop.f32.mrf.mxu0 }
 0x1cf   :  { %v689_v17 = vadd.f32 %v1249_v16, %v688_v4 }
 0x1d0   :  { %v1554_v5 = vpop.f32.mrf.mxu0 }
 0x1d1   :  { %v840_v0 = vadd.f32 %v839_v63, %v689_v17 }
 0x1e6   :  { %v1032_v6 = vpop.f32.mrf.mxu1 }
 0x1e8   :  { %v1659_v10 = vpop.f32.mrf.mxu1 }
 0x1ef   :  { %v943_v11 = vpop.f32.mrf.mxu0 }
 0x1f0   :  { %v944_v23 = vadd.f32 %v943_v11, %v840_v0 }
 0x1f1   :  { %v1624_v12 = vpop.f32.mrf.mxu0 }
 0x1f2   :  { %v1033_v24 = vadd.f32 %v1032_v6, %v944_v23 }
 0x208   :  { %v1238_v18 = vpop.f32.mrf.mxu1 }
 0x20a   :  { %v1729_v22 = vpop.f32.mrf.mxu1 }
 0x210   :  { %v1151_v27 = vpop.f32.mrf.mxu0 }
 0x211   :  { %v1152_v28 = vadd.f32 %v1151_v27, %v1033_v24 }
 0x212   :  { %v1694_v29 = vpop.f32.mrf.mxu0 }
 0x213   :  { %v1239_v33 = vadd.f32 %v1238_v18, %v1152_v28 }
 0x215   :  { %1243 = vst.msk [vmem:[%s2408_s5] sm:$0x3] %vm1242_vm2, %v1239_v33 }

</bundles_post_ra>
